<compile_context>
chip_gen: v6e
topology: v6e:2x2x1
jax: 0.10.0
libtpu: 0.0.40
codegen_flags: <defaults>
</compile_context>

<pallas_src>
import jax
import jax.numpy as jnp
from jax.experimental import pallas as pl
from jax.experimental.pallas import tpu as pltpu

_MAX_CHUNKS = 4  # DMAs kept in flight; 2-4 concurrent descriptors saturate HBM R+W


def _row_chunks(n_rows, max_chunks=_MAX_CHUNKS):
    """Split [0, n_rows) into <= max_chunks contiguous near-even (start, len) ranges."""
    num = max(1, min(max_chunks, n_rows))
    base, rem = divmod(n_rows, num)
    chunks = []
    start = 0
    for i in range(num):
        length = base + (1 if i < rem else 0)
        if length > 0:
            chunks.append((start, length))
            start += length
    return chunks


def _make_flatten_dma_kernel(chunks):
    """Build an HBM->HBM copy kernel: start one async DMA per chunk, then wait all.

    No VMEM staging, no grid, no (8,128) tiling or padding: chunk boundaries
    are static Python ints, each chunk is a contiguous byte range of the
    row-major array, and each copy gets its own DMA semaphore so all stay in
    flight simultaneously.
    """
    n_chunks = len(chunks)

    def kernel(x_hbm, o_hbm, sems):
        copies = []
        for i, (r0, rl) in enumerate(chunks):
            cp = pltpu.make_async_copy(
                x_hbm.at[pl.ds(r0, rl)],
                o_hbm.at[pl.ds(r0, rl)],
                sems.at[i],
            )
            cp.start()
            copies.append(cp)
        for cp in copies:
            cp.wait()

    return kernel, n_chunks


def flatten(x):
    """Pallas TPU equivalent of torch Flatten: x.view(-1, prod(x.shape[1:]))."""
    n = x.shape[0]
    f = 1
    for d in x.shape[1:]:
        f *= d
    itemsize = jnp.dtype(x.dtype).itemsize

    # Row-major reshape to the (N, F) output geometry: free metadata op in XLA.
    x2d = jnp.reshape(x, (n, f))

    if n == 0 or f == 0:
        return x2d  # nothing to copy

    chunks = _row_chunks(n)
    kernel, n_chunks = _make_flatten_dma_kernel(chunks)

    return pl.pallas_call(
        kernel,
        out_shape=jax.ShapeDtypeStruct((n, f), x.dtype),
        in_specs=[pl.BlockSpec(memory_space=pl.ANY)],
        out_specs=pl.BlockSpec(memory_space=pl.ANY),
        scratch_shapes=[pltpu.SemaphoreType.DMA((n_chunks,))],
        cost_estimate=pl.CostEstimate(
            flops=0,
            transcendentals=0,
            bytes_accessed=2 * n * f * itemsize,
        ),
    )(x2d)


if __name__ == "__main__":
    key = jax.random.PRNGKey(0)
    # NCHW input, consistent with what the forward implies (conv-style input)
    x = jax.random.normal(key, (2, 4, 16, 16), dtype=jnp.float32)

    y = jax.block_until_ready(flatten(x))

    assert y.shape == (2, 4 * 16 * 16), y.shape
    expected = jnp.reshape(x, (2, -1))  # reference: torch .view(-1, F) semantics
    assert jnp.array_equal(y, expected)

    print("KERNEL_OK")
</pallas_src>

<mosaic_0001>
module attributes {stable_mosaic.version = 11 : i64} {
  func.func @kernel(%arg0: memref<2x1024xf32, #tpu.memory_space<any>>, %arg1: memref<2x1024xf32, #tpu.memory_space<any>>, %arg2: memref<2x!tpu.dma_semaphore, #tpu.memory_space<semaphore_mem>>) attributes {dimension_semantics = [], scalar_prefetch = 0 : i64, scratch_operands = 1 : i64, tpu.core_type = #tpu.core_type<tc>} {
    %c0_i32 = arith.constant 0 : i32
    %c0_i32_0 = arith.constant 0 : i32
    %c0_i32_1 = arith.constant 0 : i32
    %0 = tpu.memref_slice %arg0[%c0_i32_0, %c0_i32_1] : memref<2x1024xf32, #tpu.memory_space<any>> -> memref<1x1024xf32, #tpu.memory_space<any>>
    %c0_i32_2 = arith.constant 0 : i32
    %c0_i32_3 = arith.constant 0 : i32
    %1 = tpu.memref_slice %arg1[%c0_i32_2, %c0_i32_3] : memref<2x1024xf32, #tpu.memory_space<any>> -> memref<1x1024xf32, #tpu.memory_space<any>>
    %2 = tpu.memref_slice %arg2[%c0_i32] : memref<2x!tpu.dma_semaphore, #tpu.memory_space<semaphore_mem>> -> memref<1x!tpu.dma_semaphore, #tpu.memory_space<semaphore_mem>>
    %3 = tpu.memref_squeeze %2 : memref<1x!tpu.dma_semaphore, #tpu.memory_space<semaphore_mem>> -> memref<!tpu.dma_semaphore, #tpu.memory_space<semaphore_mem>>
    tpu.enqueue_dma source(%0 : memref<1x1024xf32, #tpu.memory_space<any>>) target(%1 : memref<1x1024xf32, #tpu.memory_space<any>>) target_semaphore(%3 : memref<!tpu.dma_semaphore, #tpu.memory_space<semaphore_mem>>)
    %c1_i32 = arith.constant 1 : i32
    %c1_i32_4 = arith.constant 1 : i32
    %c0_i32_5 = arith.constant 0 : i32
    %4 = tpu.memref_slice %arg0[%c1_i32_4, %c0_i32_5] : memref<2x1024xf32, #tpu.memory_space<any>> -> memref<1x1024xf32, #tpu.memory_space<any>>
    %c1_i32_6 = arith.constant 1 : i32
    %c0_i32_7 = arith.constant 0 : i32
    %5 = tpu.memref_slice %arg1[%c1_i32_6, %c0_i32_7] : memref<2x1024xf32, #tpu.memory_space<any>> -> memref<1x1024xf32, #tpu.memory_space<any>>
    %6 = tpu.memref_slice %arg2[%c1_i32] : memref<2x!tpu.dma_semaphore, #tpu.memory_space<semaphore_mem>> -> memref<1x!tpu.dma_semaphore, #tpu.memory_space<semaphore_mem>>
    %7 = tpu.memref_squeeze %6 : memref<1x!tpu.dma_semaphore, #tpu.memory_space<semaphore_mem>> -> memref<!tpu.dma_semaphore, #tpu.memory_space<semaphore_mem>>
    tpu.enqueue_dma source(%4 : memref<1x1024xf32, #tpu.memory_space<any>>) target(%5 : memref<1x1024xf32, #tpu.memory_space<any>>) target_semaphore(%7 : memref<!tpu.dma_semaphore, #tpu.memory_space<semaphore_mem>>)
    %c0_i32_8 = arith.constant 0 : i32
    %c0_i32_9 = arith.constant 0 : i32
    %c0_i32_10 = arith.constant 0 : i32
    %8 = tpu.memref_slice %arg0[%c0_i32_9, %c0_i32_10] : memref<2x1024xf32, #tpu.memory_space<any>> -> memref<1x1024xf32, #tpu.memory_space<any>>
    %c0_i32_11 = arith.constant 0 : i32
    %c0_i32_12 = arith.constant 0 : i32
    %9 = tpu.memref_slice %arg1[%c0_i32_11, %c0_i32_12] : memref<2x1024xf32, #tpu.memory_space<any>> -> memref<1x1024xf32, #tpu.memory_space<any>>
    %10 = tpu.memref_slice %arg2[%c0_i32_8] : memref<2x!tpu.dma_semaphore, #tpu.memory_space<semaphore_mem>> -> memref<1x!tpu.dma_semaphore, #tpu.memory_space<semaphore_mem>>
    %11 = tpu.memref_squeeze %10 : memref<1x!tpu.dma_semaphore, #tpu.memory_space<semaphore_mem>> -> memref<!tpu.dma_semaphore, #tpu.memory_space<semaphore_mem>>
    tpu.wait_dma2 semaphore(%11 : memref<!tpu.dma_semaphore, #tpu.memory_space<semaphore_mem>>) src(%8 : memref<1x1024xf32, #tpu.memory_space<any>>) dst(%9 : memref<1x1024xf32, #tpu.memory_space<any>>)
    %c1_i32_13 = arith.constant 1 : i32
    %c1_i32_14 = arith.constant 1 : i32
    %c0_i32_15 = arith.constant 0 : i32
    %12 = tpu.memref_slice %arg0[%c1_i32_14, %c0_i32_15] : memref<2x1024xf32, #tpu.memory_space<any>> -> memref<1x1024xf32, #tpu.memory_space<any>>
    %c1_i32_16 = arith.constant 1 : i32
    %c0_i32_17 = arith.constant 0 : i32
    %13 = tpu.memref_slice %arg1[%c1_i32_16, %c0_i32_17] : memref<2x1024xf32, #tpu.memory_space<any>> -> memref<1x1024xf32, #tpu.memory_space<any>>
    %14 = tpu.memref_slice %arg2[%c1_i32_13] : memref<2x!tpu.dma_semaphore, #tpu.memory_space<semaphore_mem>> -> memref<1x!tpu.dma_semaphore, #tpu.memory_space<semaphore_mem>>
    %15 = tpu.memref_squeeze %14 : memref<1x!tpu.dma_semaphore, #tpu.memory_space<semaphore_mem>> -> memref<!tpu.dma_semaphore, #tpu.memory_space<semaphore_mem>>
    tpu.wait_dma2 semaphore(%15 : memref<!tpu.dma_semaphore, #tpu.memory_space<semaphore_mem>>) src(%12 : memref<1x1024xf32, #tpu.memory_space<any>>) dst(%13 : memref<1x1024xf32, #tpu.memory_space<any>>)
    return
  }
}

</mosaic_0001>

<bundles_post_ra>
// kernel: tpu_custom_call.1
= control target key start
LH: loop header
LB: loop body
LE: loop exit
PB: predicated region body
PF: predicated region fallthrough
CT: control target
= control target key end

     0   :  { %s65_s6 = smov 32   ;;  %s66_s7 = smov 1   ;;  %s93_s0 = inlined_call_operand.hbm [shape: f32[2,1024], index: 0, kind: input, shape index: {}]   ;;  %s94_s1 = inlined_call_operand.hbm [shape: f32[2,1024], index: 1, kind: output, shape index: {}]  }
   0x1   :  { %12 = sst [smem:[#allocation4]] %s65_s6  ;;  %s67_s8 = smov [#allocation2]  }
   0x2   :  { %14 = sst [smem:[#allocation4 + $0x1]] %s65_s6  ;;  %s68_s9 = smov 131072  }
   0x3   :  { %16 = sst [smem:[#allocation4 + $0x2]] %s66_s7  ;;  %s69_s10 = smov 0  }
   0x4   :  { %18 = dma.general %s93_s0, 128, %s94_s1, %s67_s8, %s68_s9, [#allocation4], %s69_s10, 0  }
   0x5   :  { %28 = sst [smem:[#allocation6]] %s65_s6  ;;  %s19_s17 = scalar_lea.hbm %s93_s0, 16 }
   0x6   :  { %30 = sst [smem:[#allocation6 + $0x1]] %s65_s6  ;;  %s20_s20 = scalar_lea.hbm %s94_s1, 16 }
   0x7   :  { %32 = sst [smem:[#allocation6 + $0x2]] %s66_s7  ;;  %s70_s21 = smov [#allocation2 + $0x1]  }
   0x8   :  { %34 = dma.general %s19_s17, 128, %s20_s20, %s70_s21, %s68_s9, [#allocation6], %s69_s10, 0  }
   0x9   :  { %61 = dma.done.wait [#allocation2], 128 }
   0xa   :  { %62 = vsyncadd [#allocation2], 4294967168 }
   0xb   :  { %63 = dma.done.wait [#allocation2 + $0x1], 128 }
   0xc   :  { %64 = vsyncadd [#allocation2 + $0x1], 4294967168 }
   0xd   :  { %40 = vsyncmov [#allocation2] }
  0x10   :  { %s41_s22 = vpop.sfrf %40 }
  0x11   :  { %p53_p0 = scmp.ne.s32.totalorder %s41_s22, 0 }
  0x13   :  { %45 = shalt.err (%p53_p0)  }
  0x14   :  { %47 = vsyncmov [#allocation2 + $0x1] }
  0x17   :  { %s48_s23 = vpop.sfrf %47 }
  0x18   :  { %p54_p1 = scmp.ne.s32.totalorder %s48_s23, 0 }
  0x1a   :  { %52 = shalt.err (%p54_p1)  }

</bundles_post_ra>
